<compile_context>
chip_gen: v7x
topology: tpu7x:2x2x1
jax: 0.10.0
libtpu: 0.0.40
codegen_flags: <defaults>
</compile_context>

<pallas_src>
import jax
import jax.numpy as jnp
from jax import lax
from jax.experimental import pallas as pl
from jax.experimental.pallas import tpu as pltpu


# Contract the last (feature / lane) axis of both operands:  A @ B^T.
_NT_DIMS = (((1,), (1,)), ((), ()))


def _qfunction_kernel(obs_ref, act_ref, w1o_ref, w1a_ref, b1_ref,
                      w2_ref, b2_ref, w3_ref, b3_ref, out_ref):
    # Layer 1: (H, obs_dim)·(tb, obs_dim)^T + (H, act_dim)·(tb, act_dim)^T
    #          -> (H, tb), f32 accumulation on the MXU.
    h = lax.dot_general(w1o_ref[...], obs_ref[...], _NT_DIMS,
                        preferred_element_type=jnp.float32)
    h = h + lax.dot_general(w1a_ref[...], act_ref[...], _NT_DIMS,
                            preferred_element_type=jnp.float32)
    h = jnp.maximum(h + b1_ref[...], 0.0)

    # Layer 2: (H, H) @ (H, tb) -> (H, tb).  Cast h to the weight dtype so the
    # bf16 path really runs bf16 on the MXU; accumulation stays f32.
    h = jnp.dot(w2_ref[...], h.astype(w2_ref.dtype),
                preferred_element_type=jnp.float32)
    h = jnp.maximum(h + b2_ref[...], 0.0)

    # Layer 3 (hidden -> 1): VPU multiply + sublane (XLU) reduce gives the
    # lane-dense (1, tb) output row directly.  b3 scalar comes from SMEM.
    q = jnp.sum(h * w3_ref[...], axis=0, keepdims=True) + b3_ref[0]
    out_ref[...] = q.astype(out_ref.dtype)


def _choose_tile_b(B, tile_b):
    """Lane-aligned batch tile; best-effort even step count for v7x megacore."""
    if B <= 256:
        return B                       # single tiny (full-batch) block
    n = max(2, pl.cdiv(B, tile_b))     # at least 2 steps so both TCs get work
    if n % 2:
        n += 1                         # even step count balances the 2 v7x TCs
    tb = pl.cdiv(B, n)
    tb = ((tb + 127) // 128) * 128     # multiple of 128 lanes
    return min(tb, B)


def qfunction_forward(obs, action, params, *, tile_b=8192,
                      min_pallas_batch=512, use_bf16=False):
    """obs: [B, obs_dim], action: [B, action_dim] -> q: [B, 1]."""
    assert obs.shape[0] == action.shape[0]
    B = obs.shape[0]
    obs_dim, act_dim = obs.shape[1], action.shape[1]
    H = params["w2"].shape[0]
    D = obs_dim + act_dim
    assert params["w1"].shape == (H, D)

    # Small-batch cutoff: launch/DMA setup dominates; XLA's fused path wins.
    if B < min_pallas_batch:
        return qfunction_ref(obs, action, params)

    in_dt = jnp.bfloat16 if use_bf16 else jnp.float32

    # Split W1 into its obs/action columns (tiny, one-time) so obs and action
    # can be streamed in natural layout with no concat/transpose HBM pass.
    w1 = params["w1"].astype(in_dt)                           # (H, D)
    w1o = w1[:, :obs_dim]                                     # (H, obs_dim)
    w1a = w1[:, obs_dim:]                                     # (H, act_dim)
    b1 = params["b1"].reshape(H, 1).astype(jnp.float32)       # (H, 1)
    w2 = params["w2"].astype(in_dt)                           # (H, H)
    b2 = params["b2"].reshape(H, 1).astype(jnp.float32)       # (H, 1)
    w3 = params["w3"].reshape(H, 1).astype(jnp.float32)       # (H, 1)
    b3 = params["b3"].reshape(1).astype(jnp.float32)          # (1,) -> SMEM

    obs_in = obs.astype(in_dt)
    act_in = action.astype(in_dt)

    tb = _choose_tile_b(B, tile_b)
    grid = (pl.cdiv(B, tb),)                                  # tail block masked

    resident = lambda shape: pl.BlockSpec(shape, lambda i: (0, 0))

    out = pl.pallas_call(
        _qfunction_kernel,
        out_shape=jax.ShapeDtypeStruct((1, B), jnp.float32),
        grid=grid,
        in_specs=[
            pl.BlockSpec((tb, obs_dim), lambda i: (i, 0)),    # obs  (batch-tiled)
            pl.BlockSpec((tb, act_dim), lambda i: (i, 0)),    # act  (batch-tiled)
            resident((H, obs_dim)),                           # w1 (obs cols)
            resident((H, act_dim)),                           # w1 (act cols)
            resident((H, 1)),                                 # b1
            resident((H, H)),                                 # w2
            resident((H, 1)),                                 # b2
            resident((H, 1)),                                 # w3
            pl.BlockSpec(memory_space=pltpu.MemorySpace.SMEM),  # b3 scalar
        ],
        out_specs=pl.BlockSpec((1, tb), lambda i: (0, i)),    # lane-dense q row
        compiler_params=pltpu.CompilerParams(
            dimension_semantics=("parallel",),                # megacore on v7x
            vmem_limit_bytes=32 * 1024 * 1024,                # headroom on v5e
        ),
    )(obs_in, act_in, w1o, w1a, b1, w2, b2, w3, b3)

    return out.reshape(B, 1)


def init_params(key, obs_dim, action_dim, hidden_dim):
    """PyTorch-style (uniform +/- 1/sqrt(fan_in)) init, nn.Linear [out, in] layout."""
    ks = jax.random.split(key, 6)
    D = obs_dim + action_dim

    def uni(k, shape, fan_in):
        bound = 1.0 / jnp.sqrt(jnp.float32(fan_in))
        return jax.random.uniform(k, shape, jnp.float32, -bound, bound)

    return {
        "w1": uni(ks[0], (hidden_dim, D), D),
        "b1": uni(ks[1], (hidden_dim,), D),
        "w2": uni(ks[2], (hidden_dim, hidden_dim), hidden_dim),
        "b2": uni(ks[3], (hidden_dim,), hidden_dim),
        "w3": uni(ks[4], (hidden_dim, 1), hidden_dim),
        "b3": uni(ks[5], (1,), hidden_dim),
    }


def qfunction_ref(obs, action, params):
    """Pure-JAX reference (mirrors the PyTorch forward)."""
    x = jnp.concatenate([obs, action], axis=1)
    h1 = jnp.maximum(x @ params["w1"].T + params["b1"], 0.0)
    h2 = jnp.maximum(h1 @ params["w2"].T + params["b2"], 0.0)
    return h2 @ params["w3"] + params["b3"]


if __name__ == "__main__":
    obs_dim, action_dim, hidden_dim = 24, 8, 32

    key = jax.random.PRNGKey(0)
    k_obs, k_act, k_params, k_big = jax.random.split(key, 4)
    params = init_params(k_params, obs_dim, action_dim, hidden_dim)

    # Tolerances are modest because TPU f32 matmuls may use bf16 MXU passes at
    # DEFAULT precision on either the XLA-reference or Pallas side.
    F32_TOL = dict(atol=5e-3, rtol=1e-3)
    BF16_TOL = dict(atol=2e-2, rtol=2e-2)

    # 1) Small batch, forced through the Pallas kernel (single full-batch block).
    batch = 8
    obs = jax.random.normal(k_obs, (batch, obs_dim), jnp.float32)
    action = jax.random.normal(k_act, (batch, action_dim), jnp.float32)
    q = jax.block_until_ready(
        qfunction_forward(obs, action, params, min_pallas_batch=0))
    q_ref = qfunction_ref(obs, action, params)
    assert q.shape == (batch, 1), q.shape
    assert jnp.allclose(q, q_ref, **F32_TOL)

    # 2) Replay-buffer-sized batch: multi-step (even) grid + masked tail tile.
    big = 2112  # deliberately not a multiple of 128
    kb1, kb2 = jax.random.split(k_big)
    obs_b = jax.random.normal(kb1, (big, obs_dim), jnp.float32)
    act_b = jax.random.normal(kb2, (big, action_dim), jnp.float32)
    q_b = jax.block_until_ready(
        qfunction_forward(obs_b, act_b, params, tile_b=512))
    q_b_ref = qfunction_ref(obs_b, act_b, params)
    assert q_b.shape == (big, 1), q_b.shape
    assert jnp.allclose(q_b, q_b_ref, **F32_TOL)

    # 3) bf16 input/weight stream (f32 accumulation) — halves HBM traffic.
    q_bf = jax.block_until_ready(
        qfunction_forward(obs_b, act_b, params, tile_b=512, use_bf16=True))
    assert jnp.allclose(q_bf, q_b_ref, **BF16_TOL)

    # 4) Tiny-batch default call takes the XLA fallback path (below cutoff).
    q_small = jax.block_until_ready(qfunction_forward(obs, action, params))
    assert jnp.allclose(q_small, q_ref, **F32_TOL)

    print("KERNEL_OK")
</pallas_src>

<mosaic_0001>
module attributes {stable_mosaic.version = 11 : i64} {
  func.func @_qfunction_kernel(%arg0: i32, %arg1: memref<8x24xf32, #tpu.memory_space<vmem>>, %arg2: memref<8x8xf32, #tpu.memory_space<vmem>>, %arg3: memref<32x24xf32, #tpu.memory_space<vmem>>, %arg4: memref<32x8xf32, #tpu.memory_space<vmem>>, %arg5: memref<32x1xf32, #tpu.memory_space<vmem>>, %arg6: memref<32x32xf32, #tpu.memory_space<vmem>>, %arg7: memref<32x1xf32, #tpu.memory_space<vmem>>, %arg8: memref<32x1xf32, #tpu.memory_space<vmem>>, %arg9: memref<1xf32, #tpu.memory_space<smem>>, %arg10: memref<1x8xf32, #tpu.memory_space<vmem>>) attributes {dimension_semantics = [#tpu.dimension_semantics<parallel>], iteration_bounds = array<i64: 1>, scalar_prefetch = 0 : i64, scratch_operands = 0 : i64, tpu.core_type = #tpu.core_type<tc>, window_params = [{transform_indices = @transform_0, window_bounds = array<i64: 8, 24>}, {transform_indices = @transform_1, window_bounds = array<i64: 8, 8>}, {pipeline_mode = #tpu.pipeline_mode<synchronous>, transform_indices = @transform_2, window_bounds = array<i64: 32, 24>}, {pipeline_mode = #tpu.pipeline_mode<synchronous>, transform_indices = @transform_3, window_bounds = array<i64: 32, 8>}, {pipeline_mode = #tpu.pipeline_mode<synchronous>, transform_indices = @transform_4, window_bounds = array<i64: 32, 1>}, {pipeline_mode = #tpu.pipeline_mode<synchronous>, transform_indices = @transform_5, window_bounds = array<i64: 32, 32>}, {pipeline_mode = #tpu.pipeline_mode<synchronous>, transform_indices = @transform_6, window_bounds = array<i64: 32, 1>}, {pipeline_mode = #tpu.pipeline_mode<synchronous>, transform_indices = @transform_7, window_bounds = array<i64: 32, 1>}, {transform_indices = @transform_8, window_bounds = array<i64: 1>}, {transform_indices = @transform_9, window_bounds = array<i64: 1, 8>}]} {
    %c0 = arith.constant 0 : index
    %c0_0 = arith.constant 0 : index
    %0 = vector.load %arg3[%c0, %c0_0] : memref<32x24xf32, #tpu.memory_space<vmem>>, vector<32x24xf32>
    %c0_1 = arith.constant 0 : index
    %c0_2 = arith.constant 0 : index
    %1 = vector.load %arg1[%c0_1, %c0_2] : memref<8x24xf32, #tpu.memory_space<vmem>>, vector<8x24xf32>
    %cst = arith.constant dense<0.000000e+00> : vector<32x8xf32>
    %2 = tpu.matmul %0, %1, %cst {dimension_numbers = #tpu.dot_dimension_numbers<[1], [1], [0], [0], [0, 0, 1, 0], [], []>} : vector<32x24xf32>, vector<8x24xf32>, vector<32x8xf32> -> vector<32x8xf32>
    %c0_3 = arith.constant 0 : index
    %c0_4 = arith.constant 0 : index
    %3 = vector.load %arg4[%c0_3, %c0_4] : memref<32x8xf32, #tpu.memory_space<vmem>>, vector<32x8xf32>
    %c0_5 = arith.constant 0 : index
    %c0_6 = arith.constant 0 : index
    %4 = vector.load %arg2[%c0_5, %c0_6] : memref<8x8xf32, #tpu.memory_space<vmem>>, vector<8x8xf32>
    %cst_7 = arith.constant dense<0.000000e+00> : vector<32x8xf32>
    %5 = tpu.matmul %3, %4, %cst_7 {dimension_numbers = #tpu.dot_dimension_numbers<[1], [1], [0], [0], [0, 0, 1, 0], [], []>} : vector<32x8xf32>, vector<8x8xf32>, vector<32x8xf32> -> vector<32x8xf32>
    %6 = arith.addf %2, %5 : vector<32x8xf32>
    %c0_8 = arith.constant 0 : index
    %c0_9 = arith.constant 0 : index
    %7 = vector.load %arg5[%c0_8, %c0_9] : memref<32x1xf32, #tpu.memory_space<vmem>>, vector<32x1xf32>
    %8 = vector.broadcast %7 : vector<32x1xf32> to vector<32x8xf32>
    %9 = arith.addf %6, %8 : vector<32x8xf32>
    %cst_10 = arith.constant 0.000000e+00 : f32
    %10 = vector.broadcast %cst_10 : f32 to vector<32x8xf32>
    %11 = arith.maximumf %9, %10 : vector<32x8xf32>
    %c0_11 = arith.constant 0 : index
    %c0_12 = arith.constant 0 : index
    %12 = vector.load %arg6[%c0_11, %c0_12] : memref<32x32xf32, #tpu.memory_space<vmem>>, vector<32x32xf32>
    %cst_13 = arith.constant dense<0.000000e+00> : vector<32x8xf32>
    %13 = tpu.matmul %12, %11, %cst_13 {dimension_numbers = #tpu.dot_dimension_numbers<[1], [0], [0], [1], [0, 0, 1, 1], [], []>} : vector<32x32xf32>, vector<32x8xf32>, vector<32x8xf32> -> vector<32x8xf32>
    %c0_14 = arith.constant 0 : index
    %c0_15 = arith.constant 0 : index
    %14 = vector.load %arg7[%c0_14, %c0_15] : memref<32x1xf32, #tpu.memory_space<vmem>>, vector<32x1xf32>
    %15 = vector.broadcast %14 : vector<32x1xf32> to vector<32x8xf32>
    %16 = arith.addf %13, %15 : vector<32x8xf32>
    %cst_16 = arith.constant 0.000000e+00 : f32
    %17 = vector.broadcast %cst_16 : f32 to vector<32x8xf32>
    %18 = arith.maximumf %16, %17 : vector<32x8xf32>
    %c0_17 = arith.constant 0 : index
    %c0_18 = arith.constant 0 : index
    %19 = vector.load %arg8[%c0_17, %c0_18] : memref<32x1xf32, #tpu.memory_space<vmem>>, vector<32x1xf32>
    %20 = vector.broadcast %19 : vector<32x1xf32> to vector<32x8xf32>
    %21 = arith.mulf %18, %20 : vector<32x8xf32>
    %cst_19 = arith.constant dense<0.000000e+00> : vector<8xf32>
    %22 = vector.multi_reduction <add>, %21, %cst_19 [0] : vector<32x8xf32> to vector<8xf32>
    %23 = vector.shape_cast %22 : vector<8xf32> to vector<1x8xf32>
    %c0_20 = arith.constant 0 : index
    %24 = memref.load %arg9[%c0_20] : memref<1xf32, #tpu.memory_space<smem>>
    %25 = vector.broadcast %24 : f32 to vector<1x8xf32>
    %26 = arith.addf %23, %25 : vector<1x8xf32>
    %c0_21 = arith.constant 0 : index
    %c0_22 = arith.constant 0 : index
    %27 = vector.load %arg10[%c0_21, %c0_22] : memref<1x8xf32, #tpu.memory_space<vmem>>, vector<1x8xf32>
    tpu.vector_store %arg10[%c0_21, %c0_22], %26 {strides = array<i32>} : memref<1x8xf32, #tpu.memory_space<vmem>>, vector<1x8xf32>,
    return
  }
  func.func @transform_0(%arg0: i32) -> (i32, i32) {
    %c0_i32 = arith.constant 0 : i32
    %c0_i32_0 = arith.constant 0 : i32
    return %arg0, %c0_i32 : i32, i32
  }
  func.func @transform_1(%arg0: i32) -> (i32, i32) {
    %c0_i32 = arith.constant 0 : i32
    %c0_i32_0 = arith.constant 0 : i32
    return %arg0, %c0_i32 : i32, i32
  }
  func.func @transform_2(%arg0: i32) -> (i32, i32) {
    %c0_i32 = arith.constant 0 : i32
    %c0_i32_0 = arith.constant 0 : i32
    %c0_i32_1 = arith.constant 0 : i32
    return %c0_i32, %c0_i32_0 : i32, i32
  }
  func.func @transform_3(%arg0: i32) -> (i32, i32) {
    %c0_i32 = arith.constant 0 : i32
    %c0_i32_0 = arith.constant 0 : i32
    %c0_i32_1 = arith.constant 0 : i32
    return %c0_i32, %c0_i32_0 : i32, i32
  }
  func.func @transform_4(%arg0: i32) -> (i32, i32) {
    %c0_i32 = arith.constant 0 : i32
    %c0_i32_0 = arith.constant 0 : i32
    %c0_i32_1 = arith.constant 0 : i32
    return %c0_i32, %c0_i32_0 : i32, i32
  }
  func.func @transform_5(%arg0: i32) -> (i32, i32) {
    %c0_i32 = arith.constant 0 : i32
    %c0_i32_0 = arith.constant 0 : i32
    %c0_i32_1 = arith.constant 0 : i32
    return %c0_i32, %c0_i32_0 : i32, i32
  }
  func.func @transform_6(%arg0: i32) -> (i32, i32) {
    %c0_i32 = arith.constant 0 : i32
    %c0_i32_0 = arith.constant 0 : i32
    %c0_i32_1 = arith.constant 0 : i32
    return %c0_i32, %c0_i32_0 : i32, i32
  }
  func.func @transform_7(%arg0: i32) -> (i32, i32) {
    %c0_i32 = arith.constant 0 : i32
    %c0_i32_0 = arith.constant 0 : i32
    %c0_i32_1 = arith.constant 0 : i32
    return %c0_i32, %c0_i32_0 : i32, i32
  }
  func.func @transform_8(%arg0: i32) -> i32 {
    %c0_i32 = arith.constant 0 : i32
    %c0_i32_0 = arith.constant 0 : i32
    return %c0_i32 : i32
  }
  func.func @transform_9(%arg0: i32) -> (i32, i32) {
    %c0_i32 = arith.constant 0 : i32
    %c0_i32_0 = arith.constant 0 : i32
    return %c0_i32, %arg0 : i32, i32
  }
}

</mosaic_0001>

<bundles_post_ra>
// kernel: tpu_custom_call.1
= control target key start
LH: loop header
LB: loop body
LE: loop exit
PB: predicated region body
PF: predicated region fallthrough
CT: control target
= control target key end

     0   :  { %vm44_vm0 = vcmask 64512   ;;  %vm145_vm1 = vcmask 195584   ;;  %v570_v4 = vmov 0   ;;  %s735_s0 = inlined_call_operand.vmem [shape: f32[8,24], index: 0, kind: input, shape index: {}]   ;;  %s736_s1 = inlined_call_operand.vmem [shape: f32[8,8], index: 1, kind: input, shape index: {}]   ;;  %s737_s2 = inlined_call_operand.vmem [shape: f32[32,24], index: 2, kind: input, shape index: {}]   ;;  %s738_s3 = inlined_call_operand.vmem [shape: f32[32,8], index: 3, kind: input, shape index: {}]   ;;  %s739_s4 = inlined_call_operand.vmem [shape: f32[32,1], index: 4, kind: input, shape index: {}]   ;;  %s740_s5 = inlined_call_operand.vmem [shape: f32[32,32], index: 5, kind: input, shape index: {}]   ;;  %s741_s6 = inlined_call_operand.vmem [shape: f32[32,1], index: 6, kind: input, shape index: {}]   ;;  %s742_s7 = inlined_call_operand.vmem [shape: f32[32,1], index: 7, kind: input, shape index: {}]   ;;  %s743_s8 = inlined_call_operand.<no memory space> [shape: f32[1], index: 8, kind: input, shape index: {}]   ;;  %s744_s9 = inlined_call_operand.hbm [shape: f32[1,8], index: 9, kind: output, shape index: {}]  }
   0x1   :  { %v43_v0 = vld [vmem:[%s736_s1] sm:$0xff]  ;;  %v40_v3 = vld [vmem:[%s738_s3 + $0x8] sm:$0xff]  ;;  %544 = vset.pattern.permute.xlu0 %v570_v4  ;;  %v41_v5 = vld [vmem:[%s738_s3 + $0x10] sm:$0xff]  ;;  %545 = vset.pattern.permute.xlu1 %v570_v4 }
   0x2   :  { %v39_v1 = vld [vmem:[%s738_s3] sm:$0xff]  ;;  %500 = vmatprep.subr.msk.mxu0 %vm44_vm0, %v43_v0  ;;  %v248_v7 = vld [vmem:[%s739_s4 + $0x10] sm:$0xff]  ;;  %v247_v8 = vld [vmem:[%s739_s4 + $0x8] sm:$0xff] }
   0x3   :  { %502 = vmatprep.mubr.msk.f32.mxu0 %vm44_vm0, %v39_v1  ;;  %v38_v2 = vld [vmem:[%s735_s0] sm:$0xff]  ;;  %501 = vmatpush3.xpose.msk.msra.mxu0 %vm44_vm0, %v43_v0  ;;  %v249_v9 = vld [vmem:[%s739_s4 + $0x18] sm:$0xff] }
   0x4   :  { %508 = vmatprep.subr.msk.mxu0 %vm145_vm1, %v38_v2  ;;  %v246_v6 = vld [vmem:[%s739_s4] sm:$0xff]  ;;  %262 = vperm.xlu1 %545, %v248_v7   ;;  %v42_v10 = vld [vmem:[%s738_s3 + $0x18] sm:$0xff] }
   0x5   :  { %252 = vperm.xlu0 %544, %v246_v6   ;;  %v34_v11 = vld [vmem:[%s737_s2] sm:$0xff] }
   0x6   :  { %503 = vmatmul.mubr.msk.f32.vlgmr.msra.gmra.mrb[0].mxu0 %vm44_vm0, %v40_v3 }
   0x7   :  { %509 = vmatpush3.xpose.msk.msra.mxu0 %vm145_vm1, %v38_v2  ;;  %505 = vmatprep.mubr.msk.f32.mxu0 %vm44_vm0, %v41_v5 }
   0x8   :  { %15 = vsyncpa [#allocation4], 0  ;;  %267 = vperm.xlu1 %545, %v249_v9   ;;  %v282_v12 = vld [vmem:[%s741_s6] sm:$0xff]  ;;  %v283_v13 = vld [vmem:[%s741_s6 + $0x8] sm:$0xff]  ;;  %vm306_vm2 = vcmask 261120   ;;  %s571_s10 = smov [#allocation3]  }
   0x9   :  { %257 = vperm.xlu0 %544, %v247_v8   ;;  %v35_v14 = vld [vmem:[%s737_s2 + $0x8] sm:$0xff]  ;;  %v36_v15 = vld [vmem:[%s737_s2 + $0x10] sm:$0xff]  ;;  %v285_v17 = vld [vmem:[%s741_s6 + $0x18] sm:$0xff]  ;;  %s460_s3 = sshll.u32 %s571_s10, 4  ;;  %vm452_vm3 = vcmask 57344   ;;  %s461_s3 = int_to_ptr.vmem [resolvable:$true] %s460_s3 }
   0xa   :  { %506 = vmatmul.mubr.msk.f32.gmra.mrb[2].mxu0 %vm44_vm0, %v42_v10  ;;  %v284_v16 = vld [vmem:[%s741_s6 + $0x10] sm:$0xff]  ;;  %v37_v18 = vld [vmem:[%s737_s2 + $0x18] sm:$0xff]  ;;  %v408_v19 = vld [vmem:[%s742_s7] sm:$0xff]  ;;  %s546_s11 = scalar_lea.vmem %s461_s3, 16  ;;  %s550_s12 = scalar_lea.vmem %s461_s3, 32 }
   0xb   :  { %510 = vmatprep.mubr.msk.f32.mxu0 %vm145_vm1, %v34_v11  ;;  %v409_v20 = vld [vmem:[%s742_s7 + $0x8] sm:$0xff]  ;;  %v410_v21 = vld [vmem:[%s742_s7 + $0x10] sm:$0xff]  ;;  %v411_v22 = vld [vmem:[%s742_s7 + $0x18] sm:$0xff]  ;;  %p547_p0 = scmp.ne.s32.totalorder %s461_s3, %s546_s11  ;;  %p551_p1 = scmp.lt.s32.totalorder %s461_s3, %s461_s3 }
   0xc   :  { %293 = vperm.xlu1 %545, %v283_v13   ;;  %v278_v23 = vld [vmem:[%s740_s5] sm:$0xff]  ;;  %v279_v42 = vld [vmem:[%s740_s5 + $0x8] sm:$0xff]  ;;  %v280_v43 = vld [vmem:[%s740_s5 + $0x10] sm:$0xff]  ;;  %p552_p2 = scmp.lt.s32.totalorder %s550_s12, %s546_s11 }
   0xd   :  { %288 = vperm.xlu0 %544, %v282_v12   ;;  %524 = vmatprep.mubr.msk.f32.mxu1 %vm306_vm2, %v278_v23  ;;  %v281_v44 = vld [vmem:[%s740_s5 + $0x18] sm:$0xff] }
   0xe   :  { %511 = vmatmul.mubr.msk.f32.vlgmr.msra.gmra.mrb[0].mxu0 %vm145_vm1, %v35_v14  ;;  %p553_p3 = por %p552_p2, %p551_p1 }
   0xf   :  { %513 = vmatprep.mubr.msk.f32.mxu0 %vm145_vm1, %v36_v15 }
  0x10   :  { %303 = vperm.xlu1 %545, %v285_v17   ;;  %v450_v17 = vstv %s743_s8  ;;  %p554_p4 = pnand %p553_p3, %p547_p0 }
  0x11   :  { %298 = vperm.xlu0 %544, %v284_v16  }
  0x12   :  { %514 = vmatmul.mubr.msk.f32.gmra.mrb[2].mxu0 %vm145_vm1, %v37_v18 }
  0x14   :  { %419 = vperm.xlu1 %545, %v409_v20  }
  0x15   :  { %414 = vperm.xlu0 %544, %v408_v19  }
  0x18   :  { %429 = vperm.xlu1 %545, %v411_v22  }
  0x19   :  { %424 = vperm.xlu0 %544, %v410_v21  }
  0x83   :  { %v263_v25 = vpop.permute.xlu1 %262 }
  0x84   :  { %v253_v24 = vpop.permute.xlu0 %252 }
  0x87   :  { %v268_v32 = vpop.permute.xlu1 %267 }
  0x88   :  { %v258_v26 = vpop.permute.xlu0 %257 }
  0x8b   :  { %v294_v46 = vpop.permute.xlu1 %293 }
  0x8c   :  { %v289_v45 = vpop.permute.xlu0 %288 }
  0x8f   :  { %v304_v48 = vpop.permute.xlu1 %303 }
  0x90   :  { %v299_v47 = vpop.permute.xlu0 %298 }
  0x93   :  { %v420_v54 = vpop.permute.xlu1 %419 }
  0x94   :  { %v415_v53 = vpop.permute.xlu0 %414 }
  0x97   :  { %v430_v4 = vpop.permute.xlu1 %429 }
  0x98   :  { %v425_v3 = vpop.permute.xlu0 %424 }
  0xe1   :  { %v512_v27 = vpop.f32.mrb[0].mxu0 }
  0xe2   :  { %v271_v28 = vadd.f32 %v512_v27, %v258_v26  ;;  %v227_v29 = vpop.f32.mrb[1].mxu0 }
  0xe3   :  { %v270_v30 = vadd.f32 %v253_v24, %v227_v29 }
  0xe4   :  { %v275_v31 = vmax.f32 %v271_v28, 0.0 }
  0xe5   :  { %v274_v33 = vmax.f32 %v270_v30, 0.0  ;;  %v515_v34 = vpop.f32.mrb[2].mxu0 }
  0xe6   :  { %v273_v35 = vadd.f32 %v515_v34, %v268_v32  ;;  %v237_v36 = vpop.f32.mrb[3].mxu0 }
  0xe7   :  { %v272_v37 = vadd.f32 %v263_v25, %v237_v36  ;;  %v530_v38 = vpack.c.bf16 %v275_v31, %v274_v33 }
  0xe8   :  { %v277_v39 = vmax.f32 %v273_v35, 0.0 }
  0xe9   :  { %v276_v40 = vmax.f32 %v272_v37, 0.0  ;;  %531 = vmatprep.subr.bf16.mxu1 %v530_v38 }
  0xea   :  { %533 = vmatpush3.bf16.msra.mxu1 %v530_v38 }
  0xeb   :  { %v534_v41 = vpack.c.bf16 %v277_v39, %v276_v40 }
  0xed   :  { %535 = vmatprep.subr.bf16.mxu1 %v534_v41 }
  0xee   :  { %537 = vmatpush3.bf16.msra.mxu1 %v534_v41 }
  0xf1   :  { %525 = vmatmul.mubr.msk.f32.vlgmr.msra.gmra.mrb[0].mxu1 %vm306_vm2, %v279_v42 }
  0xf2   :  { %527 = vmatprep.mubr.msk.f32.mxu1 %vm306_vm2, %v280_v43 }
  0xf5   :  { %528 = vmatmul.mubr.msk.f32.gmra.mrb[2].mxu1 %vm306_vm2, %v281_v44 }
 0x1c4   :  { %v526_v49 = vpop.f32.mrb[0].mxu1 }
 0x1c5   :  { %v391_v50 = vadd.f32 %v526_v49, %v294_v46  ;;  %v385_v51 = vpop.f32.mrb[1].mxu1 }
 0x1c6   :  { %v386_v52 = vadd.f32 %v385_v51, %v289_v45 }
 0x1c7   :  { %v405_v55 = vmax.f32 %v391_v50, 0.0 }
 0x1c8   :  { %v404_v56 = vmax.f32 %v386_v52, 0.0  ;;  %v529_v57 = vpop.f32.mrb[2].mxu1 }
 0x1c9   :  { %v433_v58 = vmul.f32 %v420_v54, %v405_v55  ;;  %v401_v59 = vadd.f32 %v529_v57, %v304_v48  ;;  %v395_v60 = vpop.f32.mrb[3].mxu1 }
 0x1ca   :  { %v432_v61 = vmul.f32 %v415_v53, %v404_v56  ;;  %v396_v62 = vadd.f32 %v395_v60, %v299_v47 }
 0x1cb   :  { %v437_v63 = vsel %vm44_vm0, %v433_v58, 0.0  ;;  %v407_v0 = vmax.f32 %v401_v59, 0.0 }
 0x1cc   :  { %v436_v1 = vsel %vm44_vm0, %v432_v61, 0.0  ;;  %v406_v2 = vmax.f32 %v396_v62, 0.0 }
 0x1cd   :  { %v438_v5 = vadd.f32 %v437_v63, %v436_v1  ;;  %v435_v6 = vmul.f32 %v430_v4, %v407_v0 }
 0x1ce   :  { %v434_v7 = vmul.f32 %v425_v3, %v406_v2 }
 0x1cf   :  { %v441_v10 = vsel %vm44_vm0, %v435_v6, 0.0 }
 0x1d0   :  { %v439_v8 = vsel %vm44_vm0, %v434_v7, 0.0 }
 0x1d1   :  { %v440_v9 = vadd.f32 %v439_v8, %v438_v5 }
 0x1d3   :  { %v442_v11 = vadd.f32 %v441_v10, %v440_v9 }
 0x1d5   :  { %v443_v12 = vrot.slane %v442_v11, 4 }
 0x1d7   :  { %v444_v13 = vadd.f32 %v443_v12, %v442_v11 }
 0x1d9   :  { %v445_v14 = vrot.slane %v444_v13, 2 }
 0x1db   :  { %v446_v15 = vadd.f32 %v445_v14, %v444_v13 }
 0x1dd   :  { %v447_v16 = vrot.slane %v446_v15, 1 }
 0x1df   :  { %v448_v18 = vadd.f32 %v447_v16, %v446_v15 }
 0x1e1   :  { %v451_v19 = vadd.f32 %v450_v17, %v448_v18 }
 0x1e3   :  { %453 = vst.msk [vmem:[#allocation3] sm:$0x1] %vm452_vm3, %v451_v19 }
 0x1e4   :  { %557 = shalt.err (!%p554_p4)
}
 0x1e5   :  { %s558_s15 = scalar_lea.hbm %s744_s9, 16 }
 0x1e6   :  { %p559_p5 = scmp.ne.s32.totalorder %s744_s9, %s558_s15  ;;  %p562_p6 = scmp.lt.u32.totalorder %s558_s15, %s744_s9 }
 0x1e8   :  { %p564_p7 = pnand %p562_p6, %p559_p5 }
 0x1ea   :  { %567 = shalt.err (!%p564_p7)
}
 0x1eb   :  { %463 = dma.vmem_to_hbm [thread:$0]  %s461_s3, 16, %s744_s9, [#allocation4]  }
 0x1ec   :  { %568 = dma.done.wait [#allocation4], 16  }
 0x1ed   :  { %569 = vsyncadd [#allocation4], 4294967280 }
 0x1ee   :  { %467 = vsyncpa [#allocation4], 1 }

</bundles_post_ra>
